<compile_context>
chip_gen: v6e
topology: v6e:2x2x1
jax: 0.10.0
libtpu: 0.0.40
codegen_flags: <defaults>
</compile_context>

<pallas_src>
import functools
import math

import jax
import jax.numpy as jnp
from jax import lax
from jax.experimental import pallas as pl
from jax.experimental.pallas import tpu as pltpu

NUM_CLASSES = 11
SEQUENCE_LENGTH = 2000
RECURRENT_MAX = math.pow(2.0, 1.0 / SEQUENCE_LENGTH)
C_PAD = 128                      # lane-dense classifier width (sliced to 11 outside)
VMEM_LIMIT = 32 * 1024 * 1024    # explicit: v5e scoped default is only 16 MiB


def _pick_tile(n, target, multiple):
    """Largest divisor of n that is <= target and a multiple of `multiple`
    (falls back to n itself)."""
    cand = min(n, target)
    for t in range(cand, 0, -1):
        if n % t == 0 and (t % multiple == 0 or t == n):
            return t
    return n


# ---------------------------------------------------------------------------
# Kernel 1: fused IndRNN recurrences (elementwise, VPU only, latency-bound).
#   Two lane-dense slabs processed together:
#     fwd slab columns : [rgb b0..bB-1 | flow b0..bB-1] x H   (2B*H lanes)
#     bwd slab         : same layout, time-reversed per sample outside.
# ---------------------------------------------------------------------------
def _make_indrnn_kernel(group, unroll):
    def kernel(zf_ref, zb_ref, uf_ref, ub_ref, of_ref, ob_ref, hf_ref, hb_ref):
        @pl.when(pl.program_id(0) == 0)
        def _():
            hf_ref[...] = jnp.zeros_like(hf_ref)
            hb_ref[...] = jnp.zeros_like(hb_ref)

        uf = uf_ref[...]                 # (1, D)
        ub = ub_ref[...]                 # (1, D)
        tb = zf_ref.shape[0]             # static time-block length
        n_groups = tb // group

        def body(g, carry):
            hf, hb = carry
            base = pl.multiple_of(g * group, group)
            zf_g = zf_ref[pl.ds(base, group), :]     # dense (group, D) load
            zb_g = zb_ref[pl.ds(base, group), :]
            f_rows, b_rows = [], []
            for i in range(group):                   # static unrolled group
                hf = jnp.maximum(zf_g[i:i + 1, :] + uf * hf, 0.0)
                hb = jnp.maximum(zb_g[i:i + 1, :] + ub * hb, 0.0)
                f_rows.append(hf)
                b_rows.append(hb)
            # batched, sublane-dense stores (one (group, D) store per slab)
            of_ref[pl.ds(base, group), :] = jnp.concatenate(f_rows, axis=0)
            ob_ref[pl.ds(base, group), :] = jnp.concatenate(b_rows, axis=0)
            return hf, hb

        hf, hb = lax.fori_loop(0, n_groups, body,
                               (hf_ref[...], hb_ref[...]), unroll=unroll)
        hf_ref[...] = hf
        hb_ref[...] = hb

    return kernel


def indrnn_fused(z_fwd, z_bwd_rev, u_fwd, u_bwd):
    """z_fwd / z_bwd_rev: (T, D) pre-activations (D = 2B*H), lane-dense.
    u_fwd / u_bwd: (1, D) recurrent weights tiled per column."""
    T, D = z_fwd.shape
    tb = _pick_tile(T, 256, 8)           # time block, multiple of 8 when possible
    if tb % 8 == 0:
        group = 8
    elif tb % 4 == 0:
        group = 4
    elif tb % 2 == 0:
        group = 2
    else:
        group = 1
    n_groups = tb // group
    unroll = max(1, min(n_groups, max(1, 32 // group)))   # ~32 steps visible

    grid_spec = pltpu.PrefetchScalarGridSpec(
        num_scalar_prefetch=0,
        grid=(T // tb,),
        in_specs=[
            pl.BlockSpec((tb, D), lambda t: (t, 0)),
            pl.BlockSpec((tb, D), lambda t: (t, 0)),
            pl.BlockSpec((1, D), lambda t: (0, 0)),
            pl.BlockSpec((1, D), lambda t: (0, 0)),
        ],
        out_specs=[
            pl.BlockSpec((tb, D), lambda t: (t, 0)),
            pl.BlockSpec((tb, D), lambda t: (t, 0)),
        ],
        scratch_shapes=[pltpu.VMEM((1, D), jnp.float32),
                        pltpu.VMEM((1, D), jnp.float32)],
    )
    # Serial time grid on one TensorCore: the recurrence is latency-bound, so
    # it is deliberately NOT split across v7x's two cores.
    return pl.pallas_call(
        _make_indrnn_kernel(group, unroll),
        out_shape=(jax.ShapeDtypeStruct((T, D), jnp.float32),
                   jax.ShapeDtypeStruct((T, D), jnp.float32)),
        grid_spec=grid_spec,
        compiler_params=pltpu.CompilerParams(
            dimension_semantics=("arbitrary",),
            vmem_limit_bytes=VMEM_LIMIT),
    )(z_fwd, z_bwd_rev, u_fwd, u_bwd)


# ---------------------------------------------------------------------------
# Kernel 2: attention fusion + classifier, tiled over T in kernel-1's layout.
#   For each (t, b):
#     alpha = sigmoid((rgb+flow) . wa + 2*ba)       (shared w_att, summed)
#     fused = alpha*rgb + (1-alpha)*flow
#     out   = fused @ Wo + bo   (128-lane padded -> lane-dense store)
#   The pack/pad length mask is generated in-kernel from a tiny (1, D)
#   per-column length constant and the row iota.
# ---------------------------------------------------------------------------
def _fusion_kernel(hf_ref, hb_ref, lencol_ref, waf_ref, wab_ref, ba_ref,
                   wof_ref, wob_ref, bo_ref, out_ref, *, B, H):
    tt, D = hf_ref.shape
    BH = B * H
    t0 = pl.program_id(0) * tt
    t_idx = t0 + lax.broadcasted_iota(jnp.int32, (tt, D), 0)     # (tt, D)
    valid = t_idx < lencol_ref[...]                              # (tt, D) bool

    hf = jnp.where(valid, hf_ref[...], 0.0)      # zero padded steps (pad_packed)
    hb = jnp.where(valid, hb_ref[...], 0.0)

    waf = waf_ref[...]            # (1, H)   forward half of wa
    wab = wab_ref[...]            # (1, H)   backward half of wa
    two_ba = 2.0 * ba_ref[...]    # (1, 1)   w_att bias applied to both streams
    wof = wof_ref[...]            # (H, C_PAD)
    wob = wob_ref[...]            # (H, C_PAD)
    bo = bo_ref[...]              # (1, C_PAD)

    outs = []
    for b in range(B):            # static, small batch loop (in-VMEM slices)
        rf = hf[:, b * H:(b + 1) * H]            # rgb  / fwd   (tt, H)
        ff = hf[:, BH + b * H:BH + (b + 1) * H]  # flow / fwd
        rb = hb[:, b * H:(b + 1) * H]            # rgb  / bwd
        fb = hb[:, BH + b * H:BH + (b + 1) * H]  # flow / bwd
        att = (jnp.sum((rf + ff) * waf, axis=-1, keepdims=True)
               + jnp.sum((rb + fb) * wab, axis=-1, keepdims=True)
               + two_ba)                                        # (tt, 1)
        alpha = jax.nn.sigmoid(att)
        fused_f = alpha * rf + (1.0 - alpha) * ff               # (tt, H)
        fused_b = alpha * rb + (1.0 - alpha) * fb
        o = (jnp.dot(fused_f, wof, preferred_element_type=jnp.float32)
             + jnp.dot(fused_b, wob, preferred_element_type=jnp.float32)
             + bo)                                              # (tt, C_PAD)
        outs.append(o)
    # lane-dense (tt, B*C_PAD) store (128-lane aligned concatenation)
    out_ref[...] = jnp.concatenate(outs, axis=1).astype(out_ref.dtype)


def fusion_out(h_fwd, h_bwd, len_cols, waf, wab, ba, wof, wob, bo_pad, *,
               batch, hidden):
    T, D = h_fwd.shape
    C = wof.shape[1]
    # big HBM-bound tiles, but keep >= 2 grid steps when possible (v7x megacore)
    target = max(8, min(1024, T // 2))
    tt = _pick_tile(T, target, 8)
    kernel = functools.partial(_fusion_kernel, B=batch, H=hidden)
    grid_spec = pltpu.PrefetchScalarGridSpec(
        num_scalar_prefetch=0,
        grid=(T // tt,),
        in_specs=[
            pl.BlockSpec((tt, D), lambda t: (t, 0)),
            pl.BlockSpec((tt, D), lambda t: (t, 0)),
            pl.BlockSpec((1, D), lambda t: (0, 0)),
            pl.BlockSpec((1, hidden), lambda t: (0, 0)),
            pl.BlockSpec((1, hidden), lambda t: (0, 0)),
            pl.BlockSpec((1, 1), lambda t: (0, 0)),
            pl.BlockSpec((hidden, C), lambda t: (0, 0)),
            pl.BlockSpec((hidden, C), lambda t: (0, 0)),
            pl.BlockSpec((1, C), lambda t: (0, 0)),
        ],
        out_specs=pl.BlockSpec((tt, batch * C), lambda t: (t, 0)),
    )
    return pl.pallas_call(
        kernel,
        out_shape=jax.ShapeDtypeStruct((T, batch * C), jnp.float32),
        grid_spec=grid_spec,
        compiler_params=pltpu.CompilerParams(
            dimension_semantics=("parallel",),
            vmem_limit_bytes=VMEM_LIMIT),
    )(h_fwd, h_bwd, len_cols, waf, wab, ba, wof, wob, bo_pad)


# ---------------------------------------------------------------------------
# Glue: pack/pad emulation + parameter setup.
# ---------------------------------------------------------------------------
def _reverse_by_length(x, lengths):
    """Reverse each sequence within its own length along axis 0 (padded
    positions map to themselves).  x: (T, N, H), lengths: (N,)."""
    T = x.shape[0]
    t = jnp.arange(T)[:, None]                                          # (T,1)
    idx = jnp.where(t < lengths[None, :], lengths[None, :] - 1 - t, t)  # (T,N)
    idx = jnp.broadcast_to(idx[:, :, None], x.shape)
    return jnp.take_along_axis(x, idx, axis=0)


def init_params(key, input_size, hidden_size):
    ks = jax.random.split(key, 10)
    s_in = 1.0 / math.sqrt(input_size)
    s_h2 = 1.0 / math.sqrt(2 * hidden_size)
    u = lambda k, shp, s: jax.random.uniform(k, shp, jnp.float32, -s, s)
    return dict(
        wf=u(ks[0], (input_size, hidden_size), s_in),
        bf=u(ks[1], (1, hidden_size), s_in),
        uf=u(ks[2], (1, hidden_size), RECURRENT_MAX),   # |u| <= recurrent_max
        wb=u(ks[3], (input_size, hidden_size), s_in),
        bb=u(ks[4], (1, hidden_size), s_in),
        ub=u(ks[5], (1, hidden_size), RECURRENT_MAX),
        wa=u(ks[6], (2 * hidden_size, 1), s_h2),
        ba=u(ks[7], (1, 1), s_h2),
        wo=u(ks[8], (2 * hidden_size, NUM_CLASSES), s_h2),
        bo=u(ks[9], (1, NUM_CLASSES), s_h2),
    )


@jax.jit
def net_forward(params, rgb_inputs, flow_inputs, lengths):
    """rgb_inputs / flow_inputs: (T, B, input_size), zero-padded time-major
    (pad_sequence semantics).  lengths: (B,) int32, sorted descending."""
    T, B, _ = rgb_inputs.shape
    H = params["uf"].shape[-1]
    N2 = 2 * B                       # rgb batches + flow batches
    D = N2 * H

    # --- Stack rgb & flow along the batch axis once (smallest tensors), then
    #     one projection matmul per direction with M = T*2B.  Producing the
    #     fwd / bwd slabs from separate matmuls means no slab slice passes.
    x2 = jnp.concatenate([rgb_inputs, flow_inputs], axis=1)        # (T, 2B, I)
    z_fwd = jnp.einsum("tbi,ih->tbh", x2, params["wf"]) + params["bf"]
    z_bwd = jnp.einsum("tbi,ih->tbh", x2, params["wb"]) + params["bb"]

    # --- Per-sample time reversal of the backward slab (single gather pass).
    lengths2 = jnp.concatenate([lengths, lengths], axis=0)          # (2B,)
    z_fwd = z_fwd.reshape(T, D)                                     # free reshape
    z_bwd_rev = _reverse_by_length(z_bwd, lengths2).reshape(T, D)

    # --- Recurrent weights tiled per column (feature-fast, sample-major).
    u_fwd = jnp.tile(params["uf"], (1, N2))                         # (1, D)
    u_bwd = jnp.tile(params["ub"], (1, N2))

    # --- Fused, time-blocked, elementwise recurrences (Pallas kernel 1).
    h_fwd, h_bwd_rev = indrnn_fused(z_fwd, z_bwd_rev, u_fwd, u_bwd)  # (T, D) x2

    # --- Un-reverse the backward hidden states (single gather pass).
    h_bwd = _reverse_by_length(h_bwd_rev.reshape(T, N2, H),
                               lengths2).reshape(T, D)

    # --- Tiny per-column length constant (replaces the old per-row mask stream).
    len_cols = jnp.repeat(lengths2.astype(jnp.int32), H).reshape(1, D)

    # --- Attention / classifier parameters, classifier padded to 128 lanes.
    waf = params["wa"][:H, 0].reshape(1, H)
    wab = params["wa"][H:, 0].reshape(1, H)
    wof = jnp.zeros((H, C_PAD), jnp.float32).at[:, :NUM_CLASSES].set(
        params["wo"][:H])
    wob = jnp.zeros((H, C_PAD), jnp.float32).at[:, :NUM_CLASSES].set(
        params["wo"][H:])
    bo_pad = jnp.zeros((1, C_PAD), jnp.float32).at[:, :NUM_CLASSES].set(
        params["bo"])

    out_cols = fusion_out(h_fwd, h_bwd, len_cols, waf, wab, params["ba"],
                          wof, wob, bo_pad, batch=B, hidden=H)   # (T, B*C_PAD)
    # Final slice back to 11 classes (small pass; a downstream consumer could
    # read the padded (T, B, 128) logits directly to skip it).
    logits = out_cols.reshape(T, B, C_PAD)[:, :, :NUM_CLASSES]
    return logits


if __name__ == "__main__":
    T, B, INPUT_SIZE, HIDDEN_SIZE = 8, 2, 32, 32
    key = jax.random.PRNGKey(0)
    k_p, k_rgb, k_flow = jax.random.split(key, 3)

    params = init_params(k_p, INPUT_SIZE, HIDDEN_SIZE)

    # lengths sorted descending, like pack_padded_sequence expects.
    lengths = jnp.array([8, 6], dtype=jnp.int32)
    rgb = jax.random.normal(k_rgb, (T, B, INPUT_SIZE), dtype=jnp.float32)
    flow = jax.random.normal(k_flow, (T, B, INPUT_SIZE), dtype=jnp.float32)
    # emulate pad_sequence zero padding
    pad_mask = (jnp.arange(T)[:, None] < lengths[None, :]).astype(
        jnp.float32)[:, :, None]
    rgb = rgb * pad_mask
    flow = flow * pad_mask

    out = net_forward(params, rgb, flow, lengths)
    jax.block_until_ready(out)
    assert out.shape == (T, B, NUM_CLASSES)
    print("KERNEL_OK")
</pallas_src>

<mosaic_0001>
module attributes {stable_mosaic.version = 11 : i64} {
  func.func @kernel(%arg0: i32, %arg1: memref<8x128xf32, #tpu.memory_space<vmem>>, %arg2: memref<8x128xf32, #tpu.memory_space<vmem>>, %arg3: memref<1x128xf32, #tpu.memory_space<vmem>>, %arg4: memref<1x128xf32, #tpu.memory_space<vmem>>, %arg5: memref<8x128xf32, #tpu.memory_space<vmem>>, %arg6: memref<8x128xf32, #tpu.memory_space<vmem>>, %arg7: memref<1x128xf32, #tpu.memory_space<vmem>>, %arg8: memref<1x128xf32, #tpu.memory_space<vmem>>) attributes {dimension_semantics = [#tpu.dimension_semantics<arbitrary>], iteration_bounds = array<i64: 1>, scalar_prefetch = 0 : i64, scratch_operands = 2 : i64, tpu.core_type = #tpu.core_type<tc>, window_params = [{transform_indices = @transform_0, window_bounds = array<i64: 8, 128>}, {transform_indices = @transform_1, window_bounds = array<i64: 8, 128>}, {pipeline_mode = #tpu.pipeline_mode<synchronous>, transform_indices = @transform_2, window_bounds = array<i64: 1, 128>}, {pipeline_mode = #tpu.pipeline_mode<synchronous>, transform_indices = @transform_3, window_bounds = array<i64: 1, 128>}, {transform_indices = @transform_4, window_bounds = array<i64: 8, 128>}, {transform_indices = @transform_5, window_bounds = array<i64: 8, 128>}]} {
    %c0_i32 = arith.constant 0 : i32
    %0 = arith.cmpi eq, %arg0, %c0_i32 : i32
    %1 = arith.extui %0 : i1 to i32
    %c0_i32_0 = arith.constant 0 : i32
    %2 = arith.cmpi ne, %1, %c0_i32_0 : i32
    scf.if %2 {
      %cst_32 = arith.constant 0.000000e+00 : f32
      %101 = vector.broadcast %cst_32 : f32 to vector<1x128xf32>
      %c0_33 = arith.constant 0 : index
      %c0_34 = arith.constant 0 : index
      %102 = vector.load %arg7[%c0_33, %c0_34] : memref<1x128xf32, #tpu.memory_space<vmem>>, vector<1x128xf32>
      tpu.vector_store %arg7[%c0_33, %c0_34], %101 {strides = array<i32>} : memref<1x128xf32, #tpu.memory_space<vmem>>, vector<1x128xf32>,
      %cst_35 = arith.constant 0.000000e+00 : f32
      %103 = vector.broadcast %cst_35 : f32 to vector<1x128xf32>
      %c0_36 = arith.constant 0 : index
      %c0_37 = arith.constant 0 : index
      %104 = vector.load %arg8[%c0_36, %c0_37] : memref<1x128xf32, #tpu.memory_space<vmem>>, vector<1x128xf32>
      tpu.vector_store %arg8[%c0_36, %c0_37], %103 {strides = array<i32>} : memref<1x128xf32, #tpu.memory_space<vmem>>, vector<1x128xf32>,
    } else {
    }
    %c0 = arith.constant 0 : index
    %c0_1 = arith.constant 0 : index
    %3 = vector.load %arg3[%c0, %c0_1] : memref<1x128xf32, #tpu.memory_space<vmem>>, vector<1x128xf32>
    %c0_2 = arith.constant 0 : index
    %c0_3 = arith.constant 0 : index
    %4 = vector.load %arg4[%c0_2, %c0_3] : memref<1x128xf32, #tpu.memory_space<vmem>>, vector<1x128xf32>
    %c0_4 = arith.constant 0 : index
    %c0_5 = arith.constant 0 : index
    %5 = vector.load %arg7[%c0_4, %c0_5] : memref<1x128xf32, #tpu.memory_space<vmem>>, vector<1x128xf32>
    %c0_6 = arith.constant 0 : index
    %c0_7 = arith.constant 0 : index
    %6 = vector.load %arg8[%c0_6, %c0_7] : memref<1x128xf32, #tpu.memory_space<vmem>>, vector<1x128xf32>
    %c0_i32_8 = arith.constant 0 : i32
    %c8_i32 = arith.constant 8 : i32
    %7 = arith.muli %c0_i32_8, %c8_i32 : i32
    %8 = tpu.assume_multiple %7, 8 : i32
    %9 = arith.index_cast %8 : i32 to index
    %c0_9 = arith.constant 0 : index
    %10 = vector.load %arg1[%9, %c0_9] : memref<8x128xf32, #tpu.memory_space<vmem>>, vector<8x128xf32>
    %11 = arith.index_cast %8 : i32 to index
    %c0_10 = arith.constant 0 : index
    %12 = vector.load %arg2[%11, %c0_10] : memref<8x128xf32, #tpu.memory_space<vmem>>, vector<8x128xf32>
    %13 = vector.extract_strided_slice %10 {offsets = [0, 0], sizes = [1, 128], strides = [1, 1]} : vector<8x128xf32> to vector<1x128xf32>
    %14 = arith.mulf %3, %5 : vector<1x128xf32>
    %15 = arith.addf %13, %14 : vector<1x128xf32>
    %cst = arith.constant 0.000000e+00 : f32
    %16 = vector.broadcast %cst : f32 to vector<1x128xf32>
    %17 = arith.maximumf %15, %16 : vector<1x128xf32>
    %18 = vector.extract_strided_slice %12 {offsets = [0, 0], sizes = [1, 128], strides = [1, 1]} : vector<8x128xf32> to vector<1x128xf32>
    %19 = arith.mulf %4, %6 : vector<1x128xf32>
    %20 = arith.addf %18, %19 : vector<1x128xf32>
    %cst_11 = arith.constant 0.000000e+00 : f32
    %21 = vector.broadcast %cst_11 : f32 to vector<1x128xf32>
    %22 = arith.maximumf %20, %21 : vector<1x128xf32>
    %23 = vector.extract_strided_slice %10 {offsets = [1, 0], sizes = [1, 128], strides = [1, 1]} : vector<8x128xf32> to vector<1x128xf32>
    %24 = arith.mulf %3, %17 : vector<1x128xf32>
    %25 = arith.addf %23, %24 : vector<1x128xf32>
    %cst_12 = arith.constant 0.000000e+00 : f32
    %26 = vector.broadcast %cst_12 : f32 to vector<1x128xf32>
    %27 = arith.maximumf %25, %26 : vector<1x128xf32>
    %28 = vector.extract_strided_slice %12 {offsets = [1, 0], sizes = [1, 128], strides = [1, 1]} : vector<8x128xf32> to vector<1x128xf32>
    %29 = arith.mulf %4, %22 : vector<1x128xf32>
    %30 = arith.addf %28, %29 : vector<1x128xf32>
    %cst_13 = arith.constant 0.000000e+00 : f32
    %31 = vector.broadcast %cst_13 : f32 to vector<1x128xf32>
    %32 = arith.maximumf %30, %31 : vector<1x128xf32>
    %33 = vector.extract_strided_slice %10 {offsets = [2, 0], sizes = [1, 128], strides = [1, 1]} : vector<8x128xf32> to vector<1x128xf32>
    %34 = arith.mulf %3, %27 : vector<1x128xf32>
    %35 = arith.addf %33, %34 : vector<1x128xf32>
    %cst_14 = arith.constant 0.000000e+00 : f32
    %36 = vector.broadcast %cst_14 : f32 to vector<1x128xf32>
    %37 = arith.maximumf %35, %36 : vector<1x128xf32>
    %38 = vector.extract_strided_slice %12 {offsets = [2, 0], sizes = [1, 128], strides = [1, 1]} : vector<8x128xf32> to vector<1x128xf32>
    %39 = arith.mulf %4, %32 : vector<1x128xf32>
    %40 = arith.addf %38, %39 : vector<1x128xf32>
    %cst_15 = arith.constant 0.000000e+00 : f32
    %41 = vector.broadcast %cst_15 : f32 to vector<1x128xf32>
    %42 = arith.maximumf %40, %41 : vector<1x128xf32>
    %43 = vector.extract_strided_slice %10 {offsets = [3, 0], sizes = [1, 128], strides = [1, 1]} : vector<8x128xf32> to vector<1x128xf32>
    %44 = arith.mulf %3, %37 : vector<1x128xf32>
    %45 = arith.addf %43, %44 : vector<1x128xf32>
    %cst_16 = arith.constant 0.000000e+00 : f32
    %46 = vector.broadcast %cst_16 : f32 to vector<1x128xf32>
    %47 = arith.maximumf %45, %46 : vector<1x128xf32>
    %48 = vector.extract_strided_slice %12 {offsets = [3, 0], sizes = [1, 128], strides = [1, 1]} : vector<8x128xf32> to vector<1x128xf32>
    %49 = arith.mulf %4, %42 : vector<1x128xf32>
    %50 = arith.addf %48, %49 : vector<1x128xf32>
    %cst_17 = arith.constant 0.000000e+00 : f32
    %51 = vector.broadcast %cst_17 : f32 to vector<1x128xf32>
    %52 = arith.maximumf %50, %51 : vector<1x128xf32>
    %53 = vector.extract_strided_slice %10 {offsets = [4, 0], sizes = [1, 128], strides = [1, 1]} : vector<8x128xf32> to vector<1x128xf32>
    %54 = arith.mulf %3, %47 : vector<1x128xf32>
    %55 = arith.addf %53, %54 : vector<1x128xf32>
    %cst_18 = arith.constant 0.000000e+00 : f32
    %56 = vector.broadcast %cst_18 : f32 to vector<1x128xf32>
    %57 = arith.maximumf %55, %56 : vector<1x128xf32>
    %58 = vector.extract_strided_slice %12 {offsets = [4, 0], sizes = [1, 128], strides = [1, 1]} : vector<8x128xf32> to vector<1x128xf32>
    %59 = arith.mulf %4, %52 : vector<1x128xf32>
    %60 = arith.addf %58, %59 : vector<1x128xf32>
    %cst_19 = arith.constant 0.000000e+00 : f32
    %61 = vector.broadcast %cst_19 : f32 to vector<1x128xf32>
    %62 = arith.maximumf %60, %61 : vector<1x128xf32>
    %63 = vector.extract_strided_slice %10 {offsets = [5, 0], sizes = [1, 128], strides = [1, 1]} : vector<8x128xf32> to vector<1x128xf32>
    %64 = arith.mulf %3, %57 : vector<1x128xf32>
    %65 = arith.addf %63, %64 : vector<1x128xf32>
    %cst_20 = arith.constant 0.000000e+00 : f32
    %66 = vector.broadcast %cst_20 : f32 to vector<1x128xf32>
    %67 = arith.maximumf %65, %66 : vector<1x128xf32>
    %68 = vector.extract_strided_slice %12 {offsets = [5, 0], sizes = [1, 128], strides = [1, 1]} : vector<8x128xf32> to vector<1x128xf32>
    %69 = arith.mulf %4, %62 : vector<1x128xf32>
    %70 = arith.addf %68, %69 : vector<1x128xf32>
    %cst_21 = arith.constant 0.000000e+00 : f32
    %71 = vector.broadcast %cst_21 : f32 to vector<1x128xf32>
    %72 = arith.maximumf %70, %71 : vector<1x128xf32>
    %73 = vector.extract_strided_slice %10 {offsets = [6, 0], sizes = [1, 128], strides = [1, 1]} : vector<8x128xf32> to vector<1x128xf32>
    %74 = arith.mulf %3, %67 : vector<1x128xf32>
    %75 = arith.addf %73, %74 : vector<1x128xf32>
    %cst_22 = arith.constant 0.000000e+00 : f32
    %76 = vector.broadcast %cst_22 : f32 to vector<1x128xf32>
    %77 = arith.maximumf %75, %76 : vector<1x128xf32>
    %78 = vector.extract_strided_slice %12 {offsets = [6, 0], sizes = [1, 128], strides = [1, 1]} : vector<8x128xf32> to vector<1x128xf32>
    %79 = arith.mulf %4, %72 : vector<1x128xf32>
    %80 = arith.addf %78, %79 : vector<1x128xf32>
    %cst_23 = arith.constant 0.000000e+00 : f32
    %81 = vector.broadcast %cst_23 : f32 to vector<1x128xf32>
    %82 = arith.maximumf %80, %81 : vector<1x128xf32>
    %83 = vector.extract_strided_slice %10 {offsets = [7, 0], sizes = [1, 128], strides = [1, 1]} : vector<8x128xf32> to vector<1x128xf32>
    %84 = arith.mulf %3, %77 : vector<1x128xf32>
    %85 = arith.addf %83, %84 : vector<1x128xf32>
    %cst_24 = arith.constant 0.000000e+00 : f32
    %86 = vector.broadcast %cst_24 : f32 to vector<1x128xf32>
    %87 = arith.maximumf %85, %86 : vector<1x128xf32>
    %88 = vector.extract_strided_slice %12 {offsets = [7, 0], sizes = [1, 128], strides = [1, 1]} : vector<8x128xf32> to vector<1x128xf32>
    %89 = arith.mulf %4, %82 : vector<1x128xf32>
    %90 = arith.addf %88, %89 : vector<1x128xf32>
    %cst_25 = arith.constant 0.000000e+00 : f32
    %91 = vector.broadcast %cst_25 : f32 to vector<1x128xf32>
    %92 = arith.maximumf %90, %91 : vector<1x128xf32>
    %93 = tpu.concatenate %17, %27, %37, %47, %57, %67, %77, %87 in 0 : vector<1x128xf32>, vector<1x128xf32>, vector<1x128xf32>, vector<1x128xf32>, vector<1x128xf32>, vector<1x128xf32>, vector<1x128xf32>, vector<1x128xf32> -> vector<8x128xf32>
    %94 = arith.index_cast %8 : i32 to index
    %c0_26 = arith.constant 0 : index
    %95 = vector.load %arg5[%94, %c0_26] : memref<8x128xf32, #tpu.memory_space<vmem>>, vector<8x128xf32>
    tpu.vector_store %arg5[%94, %c0_26], %93 {strides = array<i32>} : memref<8x128xf32, #tpu.memory_space<vmem>>, vector<8x128xf32>,
    %96 = tpu.concatenate %22, %32, %42, %52, %62, %72, %82, %92 in 0 : vector<1x128xf32>, vector<1x128xf32>, vector<1x128xf32>, vector<1x128xf32>, vector<1x128xf32>, vector<1x128xf32>, vector<1x128xf32>, vector<1x128xf32> -> vector<8x128xf32>
    %97 = arith.index_cast %8 : i32 to index
    %c0_27 = arith.constant 0 : index
    %98 = vector.load %arg6[%97, %c0_27] : memref<8x128xf32, #tpu.memory_space<vmem>>, vector<8x128xf32>
    tpu.vector_store %arg6[%97, %c0_27], %96 {strides = array<i32>} : memref<8x128xf32, #tpu.memory_space<vmem>>, vector<8x128xf32>,
    %c1_i32 = arith.constant 1 : i32
    %c0_28 = arith.constant 0 : index
    %c0_29 = arith.constant 0 : index
    %99 = vector.load %arg7[%c0_28, %c0_29] : memref<1x128xf32, #tpu.memory_space<vmem>>, vector<1x128xf32>
    tpu.vector_store %arg7[%c0_28, %c0_29], %87 {strides = array<i32>} : memref<1x128xf32, #tpu.memory_space<vmem>>, vector<1x128xf32>,
    %c0_30 = arith.constant 0 : index
    %c0_31 = arith.constant 0 : index
    %100 = vector.load %arg8[%c0_30, %c0_31] : memref<1x128xf32, #tpu.memory_space<vmem>>, vector<1x128xf32>
    tpu.vector_store %arg8[%c0_30, %c0_31], %92 {strides = array<i32>} : memref<1x128xf32, #tpu.memory_space<vmem>>, vector<1x128xf32>,
    return
  }
  func.func @transform_0(%arg0: i32) -> (i32, i32) {
    %c0_i32 = arith.constant 0 : i32
    %c0_i32_0 = arith.constant 0 : i32
    return %arg0, %c0_i32 : i32, i32
  }
  func.func @transform_1(%arg0: i32) -> (i32, i32) {
    %c0_i32 = arith.constant 0 : i32
    %c0_i32_0 = arith.constant 0 : i32
    return %arg0, %c0_i32 : i32, i32
  }
  func.func @transform_2(%arg0: i32) -> (i32, i32) {
    %c0_i32 = arith.constant 0 : i32
    %c0_i32_0 = arith.constant 0 : i32
    %c0_i32_1 = arith.constant 0 : i32
    return %c0_i32, %c0_i32_0 : i32, i32
  }
  func.func @transform_3(%arg0: i32) -> (i32, i32) {
    %c0_i32 = arith.constant 0 : i32
    %c0_i32_0 = arith.constant 0 : i32
    %c0_i32_1 = arith.constant 0 : i32
    return %c0_i32, %c0_i32_0 : i32, i32
  }
  func.func @transform_4(%arg0: i32) -> (i32, i32) {
    %c0_i32 = arith.constant 0 : i32
    %c0_i32_0 = arith.constant 0 : i32
    return %arg0, %c0_i32 : i32, i32
  }
  func.func @transform_5(%arg0: i32) -> (i32, i32) {
    %c0_i32 = arith.constant 0 : i32
    %c0_i32_0 = arith.constant 0 : i32
    return %arg0, %c0_i32 : i32, i32
  }
}

module attributes {stable_mosaic.version = 11 : i64} {
  func.func @_fusion_kernel(%arg0: i32, %arg1: memref<8x128xf32, #tpu.memory_space<vmem>>, %arg2: memref<8x128xf32, #tpu.memory_space<vmem>>, %arg3: memref<1x128xi32, #tpu.memory_space<vmem>>, %arg4: memref<1x32xf32, #tpu.memory_space<vmem>>, %arg5: memref<1x32xf32, #tpu.memory_space<vmem>>, %arg6: memref<1x1xf32, #tpu.memory_space<vmem>>, %arg7: memref<32x128xf32, #tpu.memory_space<vmem>>, %arg8: memref<32x128xf32, #tpu.memory_space<vmem>>, %arg9: memref<1x128xf32, #tpu.memory_space<vmem>>, %arg10: memref<8x256xf32, #tpu.memory_space<vmem>>) attributes {dimension_semantics = [#tpu.dimension_semantics<parallel>], iteration_bounds = array<i64: 1>, scalar_prefetch = 0 : i64, scratch_operands = 0 : i64, tpu.core_type = #tpu.core_type<tc>, window_params = [{transform_indices = @transform_0, window_bounds = array<i64: 8, 128>}, {transform_indices = @transform_1, window_bounds = array<i64: 8, 128>}, {pipeline_mode = #tpu.pipeline_mode<synchronous>, transform_indices = @transform_2, window_bounds = array<i64: 1, 128>}, {pipeline_mode = #tpu.pipeline_mode<synchronous>, transform_indices = @transform_3, window_bounds = array<i64: 1, 32>}, {pipeline_mode = #tpu.pipeline_mode<synchronous>, transform_indices = @transform_4, window_bounds = array<i64: 1, 32>}, {pipeline_mode = #tpu.pipeline_mode<synchronous>, transform_indices = @transform_5, window_bounds = array<i64: 1, 1>}, {pipeline_mode = #tpu.pipeline_mode<synchronous>, transform_indices = @transform_6, window_bounds = array<i64: 32, 128>}, {pipeline_mode = #tpu.pipeline_mode<synchronous>, transform_indices = @transform_7, window_bounds = array<i64: 32, 128>}, {pipeline_mode = #tpu.pipeline_mode<synchronous>, transform_indices = @transform_8, window_bounds = array<i64: 1, 128>}, {transform_indices = @transform_9, window_bounds = array<i64: 8, 256>}]} {
    %c8_i32 = arith.constant 8 : i32
    %0 = arith.muli %arg0, %c8_i32 : i32
    %1 = tpu.iota {dimensions = array<i32: 0>} : vector<8x128xi32>
    %2 = vector.broadcast %0 : i32 to vector<8x128xi32>
    %3 = arith.addi %2, %1 : vector<8x128xi32>
    %c0 = arith.constant 0 : index
    %c0_0 = arith.constant 0 : index
    %4 = vector.load %arg3[%c0, %c0_0] : memref<1x128xi32, #tpu.memory_space<vmem>>, vector<1x128xi32>
    %5 = vector.broadcast %4 : vector<1x128xi32> to vector<8x128xi32>
    %6 = arith.cmpi slt, %3, %5 : vector<8x128xi32>
    %c0_1 = arith.constant 0 : index
    %c0_2 = arith.constant 0 : index
    %7 = vector.load %arg1[%c0_1, %c0_2] : memref<8x128xf32, #tpu.memory_space<vmem>>, vector<8x128xf32>
    %cst = arith.constant 0.000000e+00 : f32
    %8 = vector.broadcast %cst : f32 to vector<8x128xf32>
    %9 = arith.select %6, %7, %8 : vector<8x128xi1>, vector<8x128xf32>
    %c0_3 = arith.constant 0 : index
    %c0_4 = arith.constant 0 : index
    %10 = vector.load %arg2[%c0_3, %c0_4] : memref<8x128xf32, #tpu.memory_space<vmem>>, vector<8x128xf32>
    %cst_5 = arith.constant 0.000000e+00 : f32
    %11 = vector.broadcast %cst_5 : f32 to vector<8x128xf32>
    %12 = arith.select %6, %10, %11 : vector<8x128xi1>, vector<8x128xf32>
    %c0_6 = arith.constant 0 : index
    %c0_7 = arith.constant 0 : index
    %13 = vector.load %arg4[%c0_6, %c0_7] : memref<1x32xf32, #tpu.memory_space<vmem>>, vector<1x32xf32>
    %c0_8 = arith.constant 0 : index
    %c0_9 = arith.constant 0 : index
    %14 = vector.load %arg5[%c0_8, %c0_9] : memref<1x32xf32, #tpu.memory_space<vmem>>, vector<1x32xf32>
    %c0_10 = arith.constant 0 : index
    %c0_11 = arith.constant 0 : index
    %15 = vector.load %arg6[%c0_10, %c0_11] : memref<1x1xf32, #tpu.memory_space<vmem>>, vector<1x1xf32>
    %cst_12 = arith.constant 2.000000e+00 : f32
    %16 = vector.broadcast %cst_12 : f32 to vector<1x1xf32>
    %17 = arith.mulf %16, %15 : vector<1x1xf32>
    %c0_13 = arith.constant 0 : index
    %c0_14 = arith.constant 0 : index
    %18 = vector.load %arg7[%c0_13, %c0_14] : memref<32x128xf32, #tpu.memory_space<vmem>>, vector<32x128xf32>
    %c0_15 = arith.constant 0 : index
    %c0_16 = arith.constant 0 : index
    %19 = vector.load %arg8[%c0_15, %c0_16] : memref<32x128xf32, #tpu.memory_space<vmem>>, vector<32x128xf32>
    %c0_17 = arith.constant 0 : index
    %c0_18 = arith.constant 0 : index
    %20 = vector.load %arg9[%c0_17, %c0_18] : memref<1x128xf32, #tpu.memory_space<vmem>>, vector<1x128xf32>
    %21 = vector.extract_strided_slice %9 {offsets = [0, 0], sizes = [8, 32], strides = [1, 1]} : vector<8x128xf32> to vector<8x32xf32>
    %22 = vector.extract_strided_slice %9 {offsets = [0, 64], sizes = [8, 32], strides = [1, 1]} : vector<8x128xf32> to vector<8x32xf32>
    %23 = vector.extract_strided_slice %12 {offsets = [0, 0], sizes = [8, 32], strides = [1, 1]} : vector<8x128xf32> to vector<8x32xf32>
    %24 = vector.extract_strided_slice %12 {offsets = [0, 64], sizes = [8, 32], strides = [1, 1]} : vector<8x128xf32> to vector<8x32xf32>
    %25 = arith.addf %21, %22 : vector<8x32xf32>
    %26 = vector.broadcast %13 : vector<1x32xf32> to vector<8x32xf32>
    %27 = arith.mulf %25, %26 : vector<8x32xf32>
    %cst_19 = arith.constant dense<0.000000e+00> : vector<8xf32>
    %28 = vector.multi_reduction <add>, %27, %cst_19 [1] : vector<8x32xf32> to vector<8xf32>
    %29 = vector.shape_cast %28 : vector<8xf32> to vector<8x1xf32>
    %30 = arith.addf %23, %24 : vector<8x32xf32>
    %31 = vector.broadcast %14 : vector<1x32xf32> to vector<8x32xf32>
    %32 = arith.mulf %30, %31 : vector<8x32xf32>
    %cst_20 = arith.constant dense<0.000000e+00> : vector<8xf32>
    %33 = vector.multi_reduction <add>, %32, %cst_20 [1] : vector<8x32xf32> to vector<8xf32>
    %34 = vector.shape_cast %33 : vector<8xf32> to vector<8x1xf32>
    %35 = arith.addf %29, %34 : vector<8x1xf32>
    %36 = vector.broadcast %17 : vector<1x1xf32> to vector<8x1xf32>
    %37 = arith.addf %35, %36 : vector<8x1xf32>
    %38 = arith.negf %37 : vector<8x1xf32>
    %39 = math.exp %38 : vector<8x1xf32>
    %cst_21 = arith.constant 1.000000e+00 : f32
    %40 = vector.broadcast %cst_21 : f32 to vector<8x1xf32>
    %41 = arith.addf %40, %39 : vector<8x1xf32>
    %42 = arith.divf %40, %41 : vector<8x1xf32>
    %43 = vector.broadcast %42 : vector<8x1xf32> to vector<8x32xf32>
    %44 = arith.mulf %43, %21 : vector<8x32xf32>
    %cst_22 = arith.constant 1.000000e+00 : f32
    %45 = vector.broadcast %cst_22 : f32 to vector<8x1xf32>
    %46 = arith.subf %45, %42 : vector<8x1xf32>
    %47 = vector.broadcast %46 : vector<8x1xf32> to vector<8x32xf32>
    %48 = arith.mulf %47, %22 : vector<8x32xf32>
    %49 = arith.addf %44, %48 : vector<8x32xf32>
    %50 = vector.broadcast %42 : vector<8x1xf32> to vector<8x32xf32>
    %51 = arith.mulf %50, %23 : vector<8x32xf32>
    %cst_23 = arith.constant 1.000000e+00 : f32
    %52 = vector.broadcast %cst_23 : f32 to vector<8x1xf32>
    %53 = arith.subf %52, %42 : vector<8x1xf32>
    %54 = vector.broadcast %53 : vector<8x1xf32> to vector<8x32xf32>
    %55 = arith.mulf %54, %24 : vector<8x32xf32>
    %56 = arith.addf %51, %55 : vector<8x32xf32>
    %cst_24 = arith.constant dense<0.000000e+00> : vector<8x128xf32>
    %57 = tpu.matmul %49, %18, %cst_24 {dimension_numbers = #tpu.dot_dimension_numbers<[1], [0], [0], [1], [0, 0, 1, 1], [], []>} : vector<8x32xf32>, vector<32x128xf32>, vector<8x128xf32> -> vector<8x128xf32>
    %cst_25 = arith.constant dense<0.000000e+00> : vector<8x128xf32>
    %58 = tpu.matmul %56, %19, %cst_25 {dimension_numbers = #tpu.dot_dimension_numbers<[1], [0], [0], [1], [0, 0, 1, 1], [], []>} : vector<8x32xf32>, vector<32x128xf32>, vector<8x128xf32> -> vector<8x128xf32>
    %59 = arith.addf %57, %58 : vector<8x128xf32>
    %60 = vector.broadcast %20 : vector<1x128xf32> to vector<8x128xf32>
    %61 = arith.addf %59, %60 : vector<8x128xf32>
    %62 = vector.extract_strided_slice %9 {offsets = [0, 32], sizes = [8, 32], strides = [1, 1]} : vector<8x128xf32> to vector<8x32xf32>
    %63 = vector.extract_strided_slice %9 {offsets = [0, 96], sizes = [8, 32], strides = [1, 1]} : vector<8x128xf32> to vector<8x32xf32>
    %64 = vector.extract_strided_slice %12 {offsets = [0, 32], sizes = [8, 32], strides = [1, 1]} : vector<8x128xf32> to vector<8x32xf32>
    %65 = vector.extract_strided_slice %12 {offsets = [0, 96], sizes = [8, 32], strides = [1, 1]} : vector<8x128xf32> to vector<8x32xf32>
    %66 = arith.addf %62, %63 : vector<8x32xf32>
    %67 = vector.broadcast %13 : vector<1x32xf32> to vector<8x32xf32>
    %68 = arith.mulf %66, %67 : vector<8x32xf32>
    %cst_26 = arith.constant dense<0.000000e+00> : vector<8xf32>
    %69 = vector.multi_reduction <add>, %68, %cst_26 [1] : vector<8x32xf32> to vector<8xf32>
    %70 = vector.shape_cast %69 : vector<8xf32> to vector<8x1xf32>
    %71 = arith.addf %64, %65 : vector<8x32xf32>
    %72 = vector.broadcast %14 : vector<1x32xf32> to vector<8x32xf32>
    %73 = arith.mulf %71, %72 : vector<8x32xf32>
    %cst_27 = arith.constant dense<0.000000e+00> : vector<8xf32>
    %74 = vector.multi_reduction <add>, %73, %cst_27 [1] : vector<8x32xf32> to vector<8xf32>
    %75 = vector.shape_cast %74 : vector<8xf32> to vector<8x1xf32>
    %76 = arith.addf %70, %75 : vector<8x1xf32>
    %77 = vector.broadcast %17 : vector<1x1xf32> to vector<8x1xf32>
    %78 = arith.addf %76, %77 : vector<8x1xf32>
    %79 = arith.negf %78 : vector<8x1xf32>
    %80 = math.exp %79 : vector<8x1xf32>
    %cst_28 = arith.constant 1.000000e+00 : f32
    %81 = vector.broadcast %cst_28 : f32 to vector<8x1xf32>
    %82 = arith.addf %81, %80 : vector<8x1xf32>
    %83 = arith.divf %81, %82 : vector<8x1xf32>
    %84 = vector.broadcast %83 : vector<8x1xf32> to vector<8x32xf32>
    %85 = arith.mulf %84, %62 : vector<8x32xf32>
    %cst_29 = arith.constant 1.000000e+00 : f32
    %86 = vector.broadcast %cst_29 : f32 to vector<8x1xf32>
    %87 = arith.subf %86, %83 : vector<8x1xf32>
    %88 = vector.broadcast %87 : vector<8x1xf32> to vector<8x32xf32>
    %89 = arith.mulf %88, %63 : vector<8x32xf32>
    %90 = arith.addf %85, %89 : vector<8x32xf32>
    %91 = vector.broadcast %83 : vector<8x1xf32> to vector<8x32xf32>
    %92 = arith.mulf %91, %64 : vector<8x32xf32>
    %cst_30 = arith.constant 1.000000e+00 : f32
    %93 = vector.broadcast %cst_30 : f32 to vector<8x1xf32>
    %94 = arith.subf %93, %83 : vector<8x1xf32>
    %95 = vector.broadcast %94 : vector<8x1xf32> to vector<8x32xf32>
    %96 = arith.mulf %95, %65 : vector<8x32xf32>
    %97 = arith.addf %92, %96 : vector<8x32xf32>
    %cst_31 = arith.constant dense<0.000000e+00> : vector<8x128xf32>
    %98 = tpu.matmul %90, %18, %cst_31 {dimension_numbers = #tpu.dot_dimension_numbers<[1], [0], [0], [1], [0, 0, 1, 1], [], []>} : vector<8x32xf32>, vector<32x128xf32>, vector<8x128xf32> -> vector<8x128xf32>
    %cst_32 = arith.constant dense<0.000000e+00> : vector<8x128xf32>
    %99 = tpu.matmul %97, %19, %cst_32 {dimension_numbers = #tpu.dot_dimension_numbers<[1], [0], [0], [1], [0, 0, 1, 1], [], []>} : vector<8x32xf32>, vector<32x128xf32>, vector<8x128xf32> -> vector<8x128xf32>
    %100 = arith.addf %98, %99 : vector<8x128xf32>
    %101 = vector.broadcast %20 : vector<1x128xf32> to vector<8x128xf32>
    %102 = arith.addf %100, %101 : vector<8x128xf32>
    %103 = tpu.concatenate %61, %102 in 1 : vector<8x128xf32>, vector<8x128xf32> -> vector<8x256xf32>
    %c0_33 = arith.constant 0 : index
    %c0_34 = arith.constant 0 : index
    %104 = vector.load %arg10[%c0_33, %c0_34] : memref<8x256xf32, #tpu.memory_space<vmem>>, vector<8x256xf32>
    tpu.vector_store %arg10[%c0_33, %c0_34], %103 {strides = array<i32>} : memref<8x256xf32, #tpu.memory_space<vmem>>, vector<8x256xf32>,
    return
  }
  func.func @transform_0(%arg0: i32) -> (i32, i32) {
    %c0_i32 = arith.constant 0 : i32
    %c0_i32_0 = arith.constant 0 : i32
    return %arg0, %c0_i32 : i32, i32
  }
  func.func @transform_1(%arg0: i32) -> (i32, i32) {
    %c0_i32 = arith.constant 0 : i32
    %c0_i32_0 = arith.constant 0 : i32
    return %arg0, %c0_i32 : i32, i32
  }
  func.func @transform_2(%arg0: i32) -> (i32, i32) {
    %c0_i32 = arith.constant 0 : i32
    %c0_i32_0 = arith.constant 0 : i32
    %c0_i32_1 = arith.constant 0 : i32
    return %c0_i32, %c0_i32_0 : i32, i32
  }
  func.func @transform_3(%arg0: i32) -> (i32, i32) {
    %c0_i32 = arith.constant 0 : i32
    %c0_i32_0 = arith.constant 0 : i32
    %c0_i32_1 = arith.constant 0 : i32
    return %c0_i32, %c0_i32_0 : i32, i32
  }
  func.func @transform_4(%arg0: i32) -> (i32, i32) {
    %c0_i32 = arith.constant 0 : i32
    %c0_i32_0 = arith.constant 0 : i32
    %c0_i32_1 = arith.constant 0 : i32
    return %c0_i32, %c0_i32_0 : i32, i32
  }
  func.func @transform_5(%arg0: i32) -> (i32, i32) {
    %c0_i32 = arith.constant 0 : i32
    %c0_i32_0 = arith.constant 0 : i32
    %c0_i32_1 = arith.constant 0 : i32
    return %c0_i32, %c0_i32_0 : i32, i32
  }
  func.func @transform_6(%arg0: i32) -> (i32, i32) {
    %c0_i32 = arith.constant 0 : i32
    %c0_i32_0 = arith.constant 0 : i32
    %c0_i32_1 = arith.constant 0 : i32
    return %c0_i32, %c0_i32_0 : i32, i32
  }
  func.func @transform_7(%arg0: i32) -> (i32, i32) {
    %c0_i32 = arith.constant 0 : i32
    %c0_i32_0 = arith.constant 0 : i32
    %c0_i32_1 = arith.constant 0 : i32
    return %c0_i32, %c0_i32_0 : i32, i32
  }
  func.func @transform_8(%arg0: i32) -> (i32, i32) {
    %c0_i32 = arith.constant 0 : i32
    %c0_i32_0 = arith.constant 0 : i32
    %c0_i32_1 = arith.constant 0 : i32
    return %c0_i32, %c0_i32_0 : i32, i32
  }
  func.func @transform_9(%arg0: i32) -> (i32, i32) {
    %c0_i32 = arith.constant 0 : i32
    %c0_i32_0 = arith.constant 0 : i32
    return %arg0, %c0_i32 : i32, i32
  }
}

</mosaic_0001>

<bundles_post_ra>
// kernel: net_forward.2
= control target key start
LH: loop header
LB: loop body
LE: loop exit
PB: predicated region body
PF: predicated region fallthrough
CT: control target
= control target key end

     0   :  { %v408_v0 = vmov 0.0   ;;  %v39_v1 = vlaneseq  ;;  %v409_v12 = vmov 1966171168   ;;  %vm373_vm0 = vcmask 1040384   ;;  %s560_s2 = inlined_call_operand.vmem [shape: f32[1,128], index: 2, kind: input, shape index: {}]   ;;  %s561_s3 = inlined_call_operand.vmem [shape: f32[1,128], index: 3, kind: input, shape index: {}]   ;;  %s562_s0 = inlined_call_operand.vmem [shape: f32[8,128], index: 0, kind: input, shape index: {}]   ;;  %s563_s1 = inlined_call_operand.vmem [shape: f32[8,128], index: 1, kind: input, shape index: {}]   ;;  %s564_s4 = inlined_call_operand.vmem [shape: f32[8,128], index: 4, kind: output, shape index: {0}]   ;;  %s565_s5 = inlined_call_operand.vmem [shape: f32[8,128], index: 5, kind: output, shape index: {1}]  }
   0x1   :  { %23 = vst [vmem:[#allocation2] sm:$0x1] %v408_v0  ;;  %24 = vst [vmem:[#allocation3] sm:$0x1] %v408_v0  ;;  %v443_v2 = vld [vmem:[%s560_s2] sm:$0x1]  ;;  %v57_v13 = vunpack.c.l.s4 %v409_v12 }
   0x2   :  { %v448_v3 = vld [vmem:[%s561_s3] sm:$0x1]  ;;  %v40_v9 = vshrl.u32 %v39_v1, 7  ;;  %vm375_vm1 = vcmask 1041408   ;;  %vm377_vm2 = vcmask 1042432   ;;  %vm379_vm3 = vcmask 1043456  }
   0x3   :  { %v453_v4 = vld [vmem:[%s562_s0] sm:$0xff]  ;;  %v58_v19 = vunpack.c.0.s8 %v57_v13  ;;  %vm381_vm4 = vcmask 1044480   ;;  %vm383_vm5 = vcmask 1045504   ;;  %vm385_vm6 = vcmask 1046528  }
   0x4   :  { %v458_v7 = vld [vmem:[%s563_s1] sm:$0xff]  ;;  %v464_v16 = vsub.s32 0, %v40_v9 }
   0x5   :  { %v471_v24 = vsub.s32 %v58_v19, %v40_v9 }
   0x8   :  { %v27_v5 = vld [vmem:[#allocation2] sm:$0x1]  ;;  %v28_v6 = vld [vmem:[#allocation3] sm:$0x1] }
   0x9   :  { %v31_v8 = vmul.f32 %v27_v5, %v443_v2  ;;  %v34_v10 = vmul.f32 %v28_v6, %v448_v3 }
   0xb   :  { %v32_v11 = vadd.f32 %v31_v8, %v453_v4  ;;  %v35_v14 = vadd.f32 %v34_v10, %v458_v7 }
   0xd   :  { %v33_v15 = vmax.f32 %v32_v11, 0.0  ;;  %v36_v17 = vmax.f32 %v35_v14, 0.0 }
   0xf   :  { %v37_v18 = vmul.f32 %v33_v15, %v443_v2  ;;  %v46_v20 = vmul.f32 %v36_v17, %v448_v3 }
  0x11   :  { %v42_v21 = vrot.slane %v37_v18, %v464_v16  ;;  %v51_v22 = vrot.slane %v46_v20, %v464_v16 }
  0x13   :  { %v44_v23 = vadd.f32 %v42_v21, %v453_v4  ;;  %v53_v25 = vadd.f32 %v51_v22, %v458_v7 }
  0x15   :  { %v45_v26 = vmax.f32 %v44_v23, 0.0  ;;  %v54_v27 = vmax.f32 %v53_v25, 0.0 }
  0x17   :  { %v62_v28 = vrot.slane %v45_v26, %v471_v24  ;;  %v374_v29 = vsel %vm373_vm0, %v33_v15, %v45_v26  ;;  %v88_v30 = vrot.slane %v54_v27, %v471_v24  ;;  %v388_v31 = vsel %vm373_vm0, %v36_v17, %v54_v27 }
  0x19   :  { %v63_v32 = vcombine.high %v62_v28, %v62_v28  ;;  %v89_v33 = vcombine.high %v88_v30, %v88_v30 }
  0x1b   :  { %v70_v34 = vrot.slane %v63_v32, %v471_v24  ;;  %v96_v35 = vrot.slane %v89_v33, %v471_v24 }
  0x1d   :  { %v72_v36 = vmul.f32 %v70_v34, %v443_v2  ;;  %v98_v37 = vmul.f32 %v96_v35, %v448_v3 }
  0x1f   :  { %v77_v38 = vrot.slane %v72_v36, %v464_v16  ;;  %v103_v39 = vrot.slane %v98_v37, %v464_v16 }
  0x21   :  { %v79_v40 = vadd.f32 %v77_v38, %v453_v4  ;;  %v105_v41 = vadd.f32 %v103_v39, %v458_v7 }
  0x23   :  { %v80_v42 = vmax.f32 %v79_v40, 0.0  ;;  %v106_v43 = vmax.f32 %v105_v41, 0.0 }
  0x25   :  { %v114_v44 = vrot.slane %v80_v42, %v471_v24  ;;  %v140_v45 = vrot.slane %v106_v43, %v471_v24  ;;  %v486_v46 = vsel %vm375_vm1, %v374_v29, %v80_v42  ;;  %v488_v47 = vsel %vm375_vm1, %v388_v31, %v106_v43 }
  0x27   :  { %v121_v48 = vrot.slane %v114_v44, %v471_v24  ;;  %v147_v49 = vrot.slane %v140_v45, %v471_v24 }
  0x29   :  { %v122_v50 = vcombine.high %v121_v48, %v121_v48  ;;  %v148_v51 = vcombine.high %v147_v49, %v147_v49 }
  0x2b   :  { %v124_v52 = vmul.f32 %v122_v50, %v443_v2  ;;  %v150_v53 = vmul.f32 %v148_v51, %v448_v3 }
  0x2d   :  { %v129_v54 = vrot.slane %v124_v52, %v464_v16  ;;  %v155_v55 = vrot.slane %v150_v53, %v464_v16 }
  0x2f   :  { %v497_v56 = vadd.f32 %v129_v54, %v453_v4  ;;  %v500_v57 = vadd.f32 %v155_v55, %v458_v7 }
  0x31   :  { %v132_v58 = vmax.f32 %v497_v56, 0.0  ;;  %v158_v59 = vmax.f32 %v500_v57, 0.0 }
  0x33   :  { %v166_v60 = vrot.slane %v132_v58, %v471_v24  ;;  %v193_v61 = vrot.slane %v158_v59, %v471_v24 }
  0x35   :  { %v167_v62 = vcombine.high %v166_v60, %v166_v60  ;;  %v194_v63 = vcombine.high %v193_v61, %v193_v61 }
  0x37   :  { %v174_v0 = vrot.slane %v167_v62, %v471_v24  ;;  %v201_v1 = vrot.slane %v194_v63, %v471_v24 }
  0x39   :  { %v175_v5 = vcombine.high %v174_v0, %v174_v0  ;;  %v202_v6 = vcombine.high %v201_v1, %v201_v1 }
  0x3b   :  { %v177_v8 = vmul.f32 %v175_v5, %v443_v2  ;;  %v204_v9 = vmul.f32 %v202_v6, %v448_v3 }
  0x3d   :  { %v182_v10 = vrot.slane %v177_v8, %v464_v16  ;;  %v209_v11 = vrot.slane %v204_v9, %v464_v16 }
  0x3f   :  { %v184_v12 = vadd.f32 %v182_v10, %v453_v4  ;;  %v211_v13 = vadd.f32 %v209_v11, %v458_v7 }
  0x41   :  { %v185_v14 = vmax.f32 %v184_v12, 0.0  ;;  %v212_v15 = vmax.f32 %v211_v13, 0.0 }
  0x43   :  { %v214_v17 = vcombine.high %v185_v14, %v185_v14  ;;  %v240_v18 = vcombine.high %v212_v15, %v212_v15 }
  0x45   :  { %v221_v19 = vrot.slane %v214_v17, %v471_v24  ;;  %v247_v20 = vrot.slane %v240_v18, %v471_v24 }
  0x47   :  { %v228_v21 = vrot.slane %v221_v19, %v471_v24  ;;  %v254_v22 = vrot.slane %v247_v20, %v471_v24 }
  0x49   :  { %v230_v23 = vmul.f32 %v228_v21, %v443_v2  ;;  %v256_v25 = vmul.f32 %v254_v22, %v448_v3 }
  0x4b   :  { %v235_v26 = vrot.slane %v230_v23, %v464_v16  ;;  %v261_v27 = vrot.slane %v256_v25, %v464_v16 }
  0x4d   :  { %v237_v28 = vadd.f32 %v235_v26, %v453_v4  ;;  %v263_v29 = vadd.f32 %v261_v27, %v458_v7 }
  0x4f   :  { %v238_v30 = vmax.f32 %v237_v28, 0.0  ;;  %v264_v31 = vmax.f32 %v263_v29, 0.0 }
  0x51   :  { %v266_v32 = vcombine.high %v238_v30, %v238_v30  ;;  %v293_v33 = vcombine.high %v264_v31, %v264_v31 }
  0x53   :  { %v273_v34 = vrot.slane %v266_v32, %v471_v24  ;;  %v300_v35 = vrot.slane %v293_v33, %v471_v24 }
  0x55   :  { %v274_v36 = vcombine.high %v273_v34, %v273_v34  ;;  %v301_v37 = vcombine.high %v300_v35, %v300_v35 }
  0x57   :  { %v281_v38 = vrot.slane %v274_v36, %v471_v24  ;;  %v308_v39 = vrot.slane %v301_v37, %v471_v24 }
  0x59   :  { %v283_v40 = vmul.f32 %v281_v38, %v443_v2  ;;  %v310_v41 = vmul.f32 %v308_v39, %v448_v3 }
  0x5b   :  { %v288_v42 = vrot.slane %v283_v40, %v464_v16  ;;  %v315_v43 = vrot.slane %v310_v41, %v464_v16 }
  0x5d   :  { %v290_v44 = vadd.f32 %v288_v42, %v453_v4  ;;  %v317_v45 = vadd.f32 %v315_v43, %v458_v7 }
  0x5f   :  { %v291_v48 = vmax.f32 %v290_v44, 0.0  ;;  %v318_v49 = vmax.f32 %v317_v45, 0.0 }
  0x61   :  { %v320_v50 = vcombine.high %v291_v48, %v291_v48  ;;  %v347_v51 = vcombine.high %v318_v49, %v318_v49 }
  0x63   :  { %v327_v52 = vrot.slane %v320_v50, %v471_v24  ;;  %v354_v53 = vrot.slane %v347_v51, %v471_v24 }
  0x65   :  { %v334_v54 = vrot.slane %v327_v52, %v471_v24  ;;  %v361_v55 = vrot.slane %v354_v53, %v471_v24  ;;  %v378_v24 = vsel %vm377_vm2, %v486_v46, %v132_v58 }
  0x67   :  { %v335_v60 = vcombine.high %v334_v54, %v334_v54  ;;  %v362_v61 = vcombine.high %v361_v55, %v361_v55 }
  0x69   :  { %v337_v62 = vmul.f32 %v335_v60, %v443_v2  ;;  %v364_v63 = vmul.f32 %v362_v61, %v448_v3  ;;  %v390_v2 = vsel %vm377_vm2, %v488_v47, %v158_v59  ;;  %v380_v3 = vsel %vm379_vm3, %v378_v24, %v185_v14 }
  0x6a   :  { %v391_v8 = vsel %vm379_vm3, %v390_v2, %v212_v15  ;;  %v382_v10 = vsel %vm381_vm4, %v380_v3, %v238_v30 }
  0x6b   :  { %v342_v0 = vrot.slane %v337_v62, %v464_v16  ;;  %v369_v1 = vrot.slane %v364_v63, %v464_v16  ;;  %v392_v11 = vsel %vm381_vm4, %v391_v8, %v264_v31  ;;  %v384_v12 = vsel %vm383_vm5, %v382_v10, %v291_v48 }
  0x6c   :  { %v393_v13 = vsel %vm383_vm5, %v392_v11, %v318_v49 }
  0x6d   :  { %v344_v5 = vadd.f32 %v342_v0, %v453_v4  ;;  %v371_v6 = vadd.f32 %v369_v1, %v458_v7 }
  0x6f   :  { %v345_v9 = vmax.f32 %v344_v5, 0.0  ;;  %v372_v16 = vmax.f32 %v371_v6, 0.0 }
  0x71   :  { %396 = vst [vmem:[#allocation2 - $0x7] sm:$0x80] %v345_v9  ;;  %397 = vst [vmem:[#allocation3 - $0x7] sm:$0x80] %v372_v16  ;;  %v386_v4 = vsel %vm385_vm6, %v384_v12, %v345_v9  ;;  %v394_v7 = vsel %vm385_vm6, %v393_v13, %v372_v16 }
  0x72   :  { %387 = vst [vmem:[%s564_s4] sm:$0xff] %v386_v4  ;;  %395 = vst [vmem:[%s565_s5] sm:$0xff] %v394_v7 }

// kernel: net_forward.3
= control target key start
LH: loop header
LB: loop body
LE: loop exit
PB: predicated region body
PF: predicated region fallthrough
CT: control target
= control target key end

     0   :  { %v35_v0 = vlaneseq  ;;  %s587_s15 = smov 32   ;;  %vm74_vm1 = vcmask 261120   ;;  %v590_v26 = vmov 0   ;;  %v591_v51 = vmov 0.0   ;;  %s752_s0 = inlined_call_operand.vmem [shape: f32[8,128], index: 0, kind: input, shape index: {}]   ;;  %s753_s2 = inlined_call_operand.vmem [shape: s32[1,128], index: 2, kind: input, shape index: {}]   ;;  %s754_s3 = inlined_call_operand.vmem [shape: f32[1,32], index: 3, kind: input, shape index: {}]   ;;  %s755_s4 = inlined_call_operand.vmem [shape: f32[1,32], index: 4, kind: input, shape index: {}]   ;;  %s756_s1 = inlined_call_operand.vmem [shape: f32[8,128], index: 1, kind: input, shape index: {}]   ;;  %s757_s5 = inlined_call_operand.<no memory space> [shape: f32[1,1], index: 5, kind: input, shape index: {}]   ;;  %s758_s6 = inlined_call_operand.vmem [shape: f32[32,128], index: 6, kind: input, shape index: {}]   ;;  %s759_s7 = inlined_call_operand.vmem [shape: f32[32,128], index: 7, kind: input, shape index: {}]   ;;  %s760_s8 = inlined_call_operand.vmem [shape: f32[1,128], index: 8, kind: input, shape index: {}]   ;;  %s761_s9 = inlined_call_operand.vmem [shape: f32[8,256], index: 9, kind: output, shape index: {}]  }
   0x1   :  { %v497_v1 = vld [vmem:[%s753_s2] ss:$0 sm:$0xff]  ;;  %s588_s2 = smov 64   ;;  %v14_v24 = vstv %s757_s5  ;;  %577 = vset.pattern.permute.xlu1 %v590_v26  ;;  %578 = vset.pattern.permute.xlu0 %v590_v26  ;;  %v56_v52 = vld [vmem:[%s758_s6 + $0x18] sm:$0xff]  ;;  %v55_v54 = vld [vmem:[%s758_s6 + $0x10] sm:$0xff]  ;;  %vm592_vm2 = vmmov 0  }
   0x2   :  { %v498_v2 = vld [vmem:[%s754_s3] ss:$0 sm:$0xff]  ;;  %v36_v3 = vshrl.u32 %v35_v0, 7  ;;  %15 = vst [vmem:[#allocation2] sm:$0x1] %v14_v24  ;;  %538 = vmatprep.subr.mxu1 %v591_v51  ;;  %527 = vmatprep.subr.mxu0 %v591_v51  ;;  %v54_v55 = vld [vmem:[%s758_s6 + $0x8] sm:$0xff] }
   0x3   :  { %v45_v4 = vld [vmem:[%s752_s0] sm:$0xff]  ;;  %285 = vrot.lane.b32.xlu1 %v498_v2, %s587_s15  ;;  %s589_s0 = smov 96   ;;  %539 = vmatpush3.msra.mxu1 %v56_v52  ;;  %v60_v56 = vld [vmem:[%s759_s7 + $0x18] sm:$0xff]  ;;  %v59_v58 = vld [vmem:[%s759_s7 + $0x10] sm:$0xff] }
   0x4   :  { %v499_v5 = vld [vmem:[%s755_s4] ss:$0 sm:$0xff]  ;;  %vm44_vm0 = vcmp.lt.s32.totalorder %v36_v3, %v497_v1  ;;  %v97_v29 = vsub.s32 0, %v36_v3  ;;  %540 = vmatprep.subr.mxu1 %v591_v51  ;;  %528 = vmatpush3.msra.mxu0 %v60_v56  ;;  %v58_v61 = vld [vmem:[%s759_s7 + $0x8] sm:$0xff] }
   0x5   :  { %v47_v6 = vld [vmem:[%s756_s1] sm:$0xff]  ;;  %v658_v7 = vsel %vm44_vm0, %v45_v4, 0.0  ;;  %541 = vmatpush3.msra.mxu1 %v55_v54  ;;  %529 = vmatprep.subr.mxu0 %v591_v51 }
   0x6   :  { %63 = vrot.lane.b32.xlu0 %v658_v7, %s588_s2  ;;  %v662_v8 = vsel %vm44_vm0, %v47_v6, 0.0  ;;  %542 = vmatprep.subr.mxu1 %v591_v51  ;;  %v53_v59 = vld [vmem:[%s758_s6] sm:$0xff] }
   0x7   :  { %296 = vrot.lane.b32.xlu1 %v499_v5, %s587_s15  ;;  %543 = vmatpush3.msra.mxu1 %v54_v55  ;;  %v57_v62 = vld [vmem:[%s759_s7] sm:$0xff] }
   0x8   :  { %544 = vmatprep.subr.mxu1 %v591_v51  ;;  %530 = vmatpush3.msra.mxu0 %v59_v58 }
   0x9   :  { %v51_v27 = vld [vmem:[#allocation2] sm:$0x1]  ;;  %545 = vmatpush3.msra.mxu1 %v53_v59  ;;  %546 = vmatprep.mubr.msk.f32.mxu1 %vm592_vm2, %v591_v51 }
   0xa   :  { %79 = vrot.lane.b32.xlu0 %v662_v8, %s588_s2  ;;  %v52_v28 = vmul.f32 2.0, %v51_v27  ;;  %531 = vmatprep.subr.mxu0 %v591_v51 }
   0xb   :  { %532 = vmatpush3.msra.mxu0 %v58_v61  ;;  %535 = vmatprep.mubr.msk.f32.mxu0 %vm592_vm2, %v591_v51 }
   0xc   :  { %v98_v31 = vrot.slane %v52_v28, %v97_v29  ;;  %533 = vmatprep.subr.mxu0 %v591_v51  ;;  %560 = vmatprep.subr.mxu1 %v591_v51 }
   0xd   :  { %534 = vmatpush3.msra.mxu0 %v57_v62 }
   0xe   :  { %549 = vmatprep.subr.mxu0 %v591_v51 }
  0x75   :  { %v286_v9 = vpop.permute.xlu1 %285 }
  0x78   :  { %v64_v10 = vpop.permute.xlu0 %63 }
  0x79   :  { %v66_v11 = vadd.f32 %v64_v10, %v658_v7  ;;  %v297_v14 = vpop.permute.xlu1 %296 }
  0x7b   :  { %v288_v12 = vmul.f32 %v286_v9, %v66_v11  ;;  %v73_v19 = vmul.f32 %v498_v2, %v66_v11 }
  0x7c   :  { %v80_v13 = vpop.permute.xlu0 %79 }
  0x7d   :  { %v82_v15 = vadd.f32 %v80_v13, %v662_v8  ;;  %290 = vrot.lane.b32.xlu0 %v288_v12, %s589_s0  ;;  %v75_v22 = vsel %vm74_vm1, %v73_v19, 0.0 }
  0x7f   :  { %v299_v16 = vmul.f32 %v297_v14, %v82_v15  ;;  %v89_v23 = vmul.f32 %v499_v5, %v82_v15 }
  0x81   :  { %301 = vrot.lane.b32.xlu1 %v299_v16, %s589_s0  ;;  %v90_v25 = vsel %vm74_vm1, %v89_v23, 0.0 }
  0xef   :  { %v291_v17 = vpop.permute.xlu0 %290 }
  0xf0   :  { %v293_v18 = vsel %vm74_vm1, %v291_v17, 0.0 }
  0xf1   :  { %294 = vadd.xlane.f32.xlu0 %v293_v18  ;;  %v503_v18 = vld [vmem:[%s760_s8] ss:$0 sm:$0xff] }
  0xf3   :  { %v302_v20 = vpop.permute.xlu1 %301 }
  0xf4   :  { %v304_v21 = vsel %vm74_vm1, %v302_v20, 0.0 }
  0xf5   :  { %305 = vadd.xlane.f32.xlu1 %v304_v21  ;;  %76 = vadd.xlane.f32.xlu0 %v75_v22 }
  0xf9   :  { %91 = vadd.xlane.f32.xlu0 %v90_v25 }
 0x17a   :  { %v295_v30 = vpop.xlane.xlu0 %294 }
 0x17e   :  { %v306_v32 = vpop.xlane.xlu1 %305  ;;  %v77_v33 = vpop.xlane.xlu0 %76 }
 0x17f   :  { %v307_v34 = vadd.f32 %v306_v32, %v295_v30 }
 0x181   :  { %v308_v35 = vadd.f32 %v307_v34, %v98_v31 }
 0x182   :  { %v92_v36 = vpop.xlane.xlu0 %91 }
 0x183   :  { %v504_v37 = vmul.f32 -1.442695, %v308_v35  ;;  %v93_v38 = vadd.f32 %v92_v36, %v77_v33 }
 0x185   :  { %579 = vpow2.f32 %v504_v37  ;;  %v100_v39 = vadd.f32 %v98_v31, %v93_v38 }
 0x187   :  { %v500_v40 = vmul.f32 -1.442695, %v100_v39 }
 0x189   :  { %581 = vpow2.f32 %v500_v40 }
 0x192   :  { %v580_v41 = vpop.eup %579 }
 0x193   :  { %v312_v42 = vadd.f32 1.0, %v580_v41 }
 0x195   :  { %583 = vrcp.f32 %v312_v42 }
 0x196   :  { %v582_v43 = vpop.eup %581 }
 0x197   :  { %v104_v44 = vadd.f32 1.0, %v582_v43 }
 0x199   :  { %585 = vrcp.f32 %v104_v44 }
 0x1a2   :  { %v584_v45 = vpop.eup %583 }
 0x1a3   :  { %v321_v46 = vsub.f32 1.0, %v584_v45 }
 0x1a5   :  { %324 = vperm.xlu1 %577, %v321_v46  }
 0x1a6   :  { %v586_v47 = vpop.eup %585 }
 0x1a7   :  { %v113_v48 = vsub.f32 1.0, %v586_v47 }
 0x1a9   :  { %317 = vperm.xlu1 %577, %v584_v45   ;;  %116 = vperm.xlu0 %578, %v113_v48  }
 0x220   :  { %v325_v49 = vpop.permute.xlu1 %324 }
 0x221   :  { %v327_v50 = vmul.f32 %v325_v49, %v658_v7  ;;  %v334_v53 = vmul.f32 %v325_v49, %v662_v8 }
 0x223   :  { %329 = vrot.lane.b32.xlu1 %v327_v50, %s588_s2 }
 0x224   :  { %v117_v57 = vpop.permute.xlu0 %116  ;;  %v318_v0 = vpop.permute.xlu1 %317 }
 0x225   :  { %v119_v60 = vmul.f32 %v117_v57, %v658_v7  ;;  %v126_v63 = vmul.f32 %v117_v57, %v662_v8  ;;  %v333_v2 = vmul.f32 %v318_v0, %v662_v8  ;;  %v320_v5 = vmul.f32 %v318_v0, %v658_v7 }
 0x227   :  { %336 = vrot.lane.b32.xlu1 %v334_v53, %s588_s2 }
 0x22b   :  { %109 = vperm.xlu1 %577, %v586_v47  }
 0x22f   :  { %121 = vrot.lane.b32.xlu1 %v119_v60, %s588_s2 }
 0x233   :  { %128 = vrot.lane.b32.xlu1 %v126_v63, %s588_s2 }
 0x295   :  { %v330_v1 = vpop.permute.xlu1 %329 }
 0x296   :  { %v332_v6 = vadd.f32 %v330_v1, %v320_v5 }
 0x299   :  { %v337_v3 = vpop.permute.xlu1 %336 }
 0x29a   :  { %v339_v4 = vadd.f32 %v337_v3, %v333_v2 }
 0x29c   :  { %341 = vrot.lane.b32.xlu1 %v339_v4, %s589_s0 }
 0x2a0   :  { %416 = vrot.lane.b32.xlu1 %v332_v6, %s589_s0 }
 0x2a6   :  { %v110_v9 = vpop.permute.xlu1 %109 }
 0x2a7   :  { %v112_v10 = vmul.f32 %v110_v9, %v658_v7  ;;  %v125_v13 = vmul.f32 %v110_v9, %v662_v8 }
 0x2aa   :  { %v122_v11 = vpop.permute.xlu1 %121 }
 0x2ab   :  { %v124_v12 = vadd.f32 %v122_v11, %v112_v10 }
 0x2ad   :  { %547 = vmatmul.mubr.msk.f32.vlgmr.msra.gmra.mxu1 %vm74_vm1, %v124_v12 }
 0x2ae   :  { %v129_v14 = vpop.permute.xlu1 %128  ;;  %561 = vmatpush3.msra.mxu1 %v56_v52  ;;  %568 = vmatprep.mubr.msk.f32.mxu1 %vm592_vm2, %v591_v51 }
 0x2af   :  { %v131_v15 = vadd.f32 %v129_v14, %v125_v13  ;;  %562 = vmatprep.subr.mxu1 %v591_v51 }
 0x2b0   :  { %563 = vmatpush3.msra.mxu1 %v55_v54 }
 0x2b1   :  { %536 = vmatmul.mubr.msk.f32.vlgmr.msra.gmra.mxu0 %vm74_vm1, %v131_v15  ;;  %564 = vmatprep.subr.mxu1 %v591_v51 }
 0x2b2   :  { %550 = vmatpush3.msra.mxu0 %v60_v56  ;;  %557 = vmatprep.mubr.msk.f32.mxu0 %vm592_vm2, %v591_v51 }
 0x2b3   :  { %551 = vmatprep.subr.mxu0 %v591_v51  ;;  %565 = vmatpush3.msra.mxu1 %v54_v55 }
 0x2b4   :  { %552 = vmatpush3.msra.mxu0 %v59_v58  ;;  %566 = vmatprep.subr.mxu1 %v591_v51 }
 0x2b5   :  { %553 = vmatprep.subr.mxu0 %v591_v51  ;;  %567 = vmatpush3.msra.mxu1 %v53_v59 }
 0x2b6   :  { %554 = vmatpush3.msra.mxu0 %v58_v61 }
 0x2b7   :  { %555 = vmatprep.subr.mxu0 %v591_v51 }
 0x2b8   :  { %556 = vmatpush3.msra.mxu0 %v57_v62 }
 0x30e   :  { %v342_v7 = vpop.permute.xlu1 %341 }
 0x30f   :  { %558 = vmatmul.mubr.msk.f32.vlgmr.msra.gmra.mxu0 %vm74_vm1, %v342_v7 }
 0x312   :  { %v417_v8 = vpop.permute.xlu1 %416 }
 0x313   :  { %569 = vmatmul.mubr.msk.f32.vlgmr.msra.gmra.mxu1 %vm74_vm1, %v417_v8 }
 0x36d   :  { %v274_v16 = vpop.f32.mrf.mxu1 }
 0x36f   :  { %v548_v17 = vpop.f32.mrf.mxu1 }
 0x371   :  { %v201_v19 = vpop.f32.mrf.mxu0 }
 0x372   :  { %v275_v20 = vadd.f32 %v274_v16, %v201_v19 }
 0x373   :  { %v537_v21 = vpop.f32.mrf.mxu0 }
 0x374   :  { %v284_v22 = vadd.f32 %v503_v18, %v275_v20 }
 0x376   :  { %491 = vst [vmem:[%s761_s9] sm:$0xff] %v284_v22 }
 0x3cf   :  { %v411_v23 = vpop.f32.mrf.mxu0 }
 0x3d1   :  { %v559_v24 = vpop.f32.mrf.mxu0 }
 0x3d3   :  { %v486_v25 = vpop.f32.mrf.mxu1 }
 0x3d4   :  { %v487_v26 = vadd.f32 %v486_v25, %v411_v23 }
 0x3d5   :  { %v570_v27 = vpop.f32.mrf.mxu1 }
 0x3d6   :  { %v490_v28 = vadd.f32 %v503_v18, %v487_v26 }
 0x3d8   :  { %492 = vst [vmem:[%s761_s9 + $0x8] sm:$0xff] %v490_v28 }

</bundles_post_ra>
